<compile_context>
chip_gen: v7x
topology: tpu7x:2x2x1
jax: 0.10.0
libtpu: 0.0.40
codegen_flags: <defaults>
</compile_context>

<pallas_src>
import math

import jax
import jax.numpy as jnp
from jax.experimental import pallas as pl
from jax.experimental.pallas import tpu as pltpu


def attention_kernel(hidden_ref, enc_ref, wh_ref, we_ref, b_ref, v_ref, out_ref):
    # hidden_ref: (bB, H)      enc_ref: (T, bB, H)  (seq-first, H on lanes)
    # wh_ref/we_ref: (H, H)    b_ref/v_ref: (1, H)  out_ref: (bB, T)
    enc = enc_ref[...]
    H = enc.shape[-1]

    # Hidden projection with the bias folded in -- once per batch block.
    hb = jax.lax.dot_general(
        hidden_ref[...], wh_ref[...],
        dimension_numbers=(((1,), (1,)), ((), ())),
        preferred_element_type=jnp.float32,
    ) + b_ref[...]                                               # (bB, H)

    # Encoder projection: contract H; the (T, bB) leading dims collapse onto
    # the MXU M dimension, i.e. one large 2-D matmul per block.
    e_proj = jax.lax.dot_general(
        enc, we_ref[...],
        dimension_numbers=(((2,), (1,)), ((), ())),
        preferred_element_type=jnp.float32,
    )                                                            # (T, bB, H)

    energy = jnp.maximum(e_proj + hb[None, :, :], 0.0)           # (T, bB, H)

    # score[t, b] = energy[t, b, :] . v
    if H >= 128:
        # MXU matvec: keeps the reduction off the VPU/XLU when H spans
        # multiple lanes-worth of data.
        scores = jax.lax.dot_general(
            energy, v_ref[...],
            dimension_numbers=(((2,), (1,)), ((), ())),
            preferred_element_type=jnp.float32,
        )[..., 0]                                                # (T, bB)
    else:
        scores = jnp.sum(energy * v_ref[...][None, :, :], axis=-1)  # (T, bB)

    # Softmax over T, written lane-dense as (bB, T).  T is never padded here
    # (the block covers the full T extent), so no masking is needed.
    s = scores.T                                                 # (bB, T)  small XLU transpose
    m = jnp.max(s, axis=-1, keepdims=True)
    ex = jnp.exp(s - m)
    out_ref[...] = (ex / jnp.sum(ex, axis=-1, keepdims=True)).astype(out_ref.dtype)


def _pick_batch_tile(B, T, H):
    """Largest sublane-aligned batch tile whose working set stays small in VMEM."""
    if B <= 8:
        return B
    per_row = T * H * 4                # f32 bytes of one batch row of the enc tile
    budget = 4 << 20                   # ~4 MiB of per-block activations (enc x2 buf + temps)
    bB = 8
    for cand in (256, 128, 64, 32, 16, 8):
        if cand <= B and per_row * cand * 4 <= budget:
            bB = cand
            break
    return bB


def attention_forward(hidden, encoder_outputs, W, bias, v):
    """hidden: (B, H) f32; encoder_outputs: (T, B, H) f32; W: (H, 2H);
    bias, v: (H,).  Returns (B, 1, T) attention weights like the PyTorch module."""
    T, B, H = encoder_outputs.shape
    Wh = W[:, :H]          # applied to the (repeated) decoder hidden state
    We = W[:, H:]          # applied to the encoder outputs
    b2 = bias.reshape(1, H)
    v2 = v.reshape(1, H)

    # TODO(synk): tile T with an online softmax (pl.when init/finalize, masked
    # padding) once T*H grows past a few MiB per block (v7x VMEM first).
    bB = _pick_batch_tile(B, T, H)
    grid = (pl.cdiv(B, bB),)

    cost = pl.CostEstimate(
        flops=2 * T * B * H * H + 2 * B * H * H + 4 * T * B * H,
        transcendentals=B * T,
        bytes_accessed=4 * (T * B * H + B * H + 2 * H * H + 2 * H + B * T),
    )

    out_bt = pl.pallas_call(
        attention_kernel,
        out_shape=jax.ShapeDtypeStruct((B, T), jnp.float32),
        grid_spec=pltpu.PrefetchScalarGridSpec(
            num_scalar_prefetch=0,
            grid=grid,
            in_specs=[
                pl.BlockSpec((bB, H), lambda i: (i, 0)),         # hidden
                pl.BlockSpec((T, bB, H), lambda i: (0, i, 0)),   # encoder_outputs
                pl.BlockSpec((H, H), lambda i: (0, 0)),          # Wh
                pl.BlockSpec((H, H), lambda i: (0, 0)),          # We
                pl.BlockSpec((1, H), lambda i: (0, 0)),          # bias
                pl.BlockSpec((1, H), lambda i: (0, 0)),          # v
            ],
            out_specs=pl.BlockSpec((bB, T), lambda i: (i, 0)),
        ),
        compiler_params=pltpu.CompilerParams(
            dimension_semantics=("parallel",),
        ),
        cost_estimate=cost,
    )(hidden, encoder_outputs, Wh, We, b2, v2)

    return out_bt[:, None, :]   # (B, 1, T)


def attention_reference(hidden, encoder_outputs, W, bias, v):
    """Pure-JAX reference mirroring the PyTorch module."""
    T, B, H = encoder_outputs.shape
    h = jnp.broadcast_to(hidden[None, :, :], (T, B, H)).transpose(1, 0, 2)  # (B,T,H)
    enc = encoder_outputs.transpose(1, 0, 2)                                # (B,T,H)
    cat = jnp.concatenate([h, enc], axis=2)                                 # (B,T,2H)
    energy = jax.nn.relu(jnp.einsum("btk,hk->bth", cat, W) + bias)          # (B,T,H)
    scores = jnp.einsum("bth,h->bt", energy, v)                             # (B,T)
    return jax.nn.softmax(scores, axis=1)[:, None, :]                       # (B,1,T)


if __name__ == "__main__":
    B, T, H = 2, 8, 32
    key = jax.random.PRNGKey(0)
    k_hid, k_enc, k_w, k_b, k_v = jax.random.split(key, 5)

    hidden = jax.random.normal(k_hid, (B, H), dtype=jnp.float32)
    encoder_outputs = jax.random.normal(k_enc, (T, B, H), dtype=jnp.float32)

    # Deterministic parameter init matching the PyTorch module's shapes:
    #   attn: Linear(2H -> H)  => W: (H, 2H), bias: (H,), uniform(-1/sqrt(2H), 1/sqrt(2H))
    #   v: (H,), uniform(-1/sqrt(H), 1/sqrt(H))
    lim_w = 1.0 / math.sqrt(2 * H)
    lim_v = 1.0 / math.sqrt(H)
    W = jax.random.uniform(k_w, (H, 2 * H), jnp.float32, -lim_w, lim_w)
    bias = jax.random.uniform(k_b, (H,), jnp.float32, -lim_w, lim_w)
    v = jax.random.uniform(k_v, (H,), jnp.float32, -lim_v, lim_v)

    out = attention_forward(hidden, encoder_outputs, W, bias, v)
    out = jax.block_until_ready(out)

    ref = attention_reference(hidden, encoder_outputs, W, bias, v)
    assert out.shape == (B, 1, T), out.shape
    assert jnp.allclose(out, ref, atol=1e-5, rtol=1e-5), "mismatch vs reference"

    print("KERNEL_OK")
</pallas_src>

<mosaic_0001>
module attributes {stable_mosaic.version = 11 : i64} {
  func.func @attention_kernel(%arg0: i32, %arg1: memref<2x32xf32, #tpu.memory_space<vmem>>, %arg2: memref<8x2x32xf32, #tpu.memory_space<vmem>>, %arg3: memref<32x32xf32, #tpu.memory_space<vmem>>, %arg4: memref<32x32xf32, #tpu.memory_space<vmem>>, %arg5: memref<1x32xf32, #tpu.memory_space<vmem>>, %arg6: memref<1x32xf32, #tpu.memory_space<vmem>>, %arg7: memref<2x8xf32, #tpu.memory_space<vmem>>) attributes {dimension_semantics = [#tpu.dimension_semantics<parallel>], iteration_bounds = array<i64: 1>, scalar_prefetch = 0 : i64, scratch_operands = 0 : i64, tpu.core_type = #tpu.core_type<tc>, window_params = [{transform_indices = @transform_0, window_bounds = array<i64: 2, 32>}, {transform_indices = @transform_1, window_bounds = array<i64: 8, 2, 32>}, {pipeline_mode = #tpu.pipeline_mode<synchronous>, transform_indices = @transform_2, window_bounds = array<i64: 32, 32>}, {pipeline_mode = #tpu.pipeline_mode<synchronous>, transform_indices = @transform_3, window_bounds = array<i64: 32, 32>}, {pipeline_mode = #tpu.pipeline_mode<synchronous>, transform_indices = @transform_4, window_bounds = array<i64: 1, 32>}, {pipeline_mode = #tpu.pipeline_mode<synchronous>, transform_indices = @transform_5, window_bounds = array<i64: 1, 32>}, {transform_indices = @transform_6, window_bounds = array<i64: 2, 8>}]} {
    %c0 = arith.constant 0 : index
    %c0_0 = arith.constant 0 : index
    %c0_1 = arith.constant 0 : index
    %0 = vector.load %arg2[%c0, %c0_0, %c0_1] : memref<8x2x32xf32, #tpu.memory_space<vmem>>, vector<8x2x32xf32>
    %c0_2 = arith.constant 0 : index
    %c0_3 = arith.constant 0 : index
    %1 = vector.load %arg1[%c0_2, %c0_3] : memref<2x32xf32, #tpu.memory_space<vmem>>, vector<2x32xf32>
    %c0_4 = arith.constant 0 : index
    %c0_5 = arith.constant 0 : index
    %2 = vector.load %arg3[%c0_4, %c0_5] : memref<32x32xf32, #tpu.memory_space<vmem>>, vector<32x32xf32>
    %cst = arith.constant dense<0.000000e+00> : vector<2x32xf32>
    %3 = tpu.matmul %1, %2, %cst {dimension_numbers = #tpu.dot_dimension_numbers<[1], [1], [0], [0], [0, 0, 1, 0], [], []>} : vector<2x32xf32>, vector<32x32xf32>, vector<2x32xf32> -> vector<2x32xf32>
    %c0_6 = arith.constant 0 : index
    %c0_7 = arith.constant 0 : index
    %4 = vector.load %arg5[%c0_6, %c0_7] : memref<1x32xf32, #tpu.memory_space<vmem>>, vector<1x32xf32>
    %5 = vector.broadcast %4 : vector<1x32xf32> to vector<2x32xf32>
    %6 = arith.addf %3, %5 : vector<2x32xf32>
    %c0_8 = arith.constant 0 : index
    %c0_9 = arith.constant 0 : index
    %7 = vector.load %arg4[%c0_8, %c0_9] : memref<32x32xf32, #tpu.memory_space<vmem>>, vector<32x32xf32>
    %cst_10 = arith.constant dense<0.000000e+00> : vector<8x2x32xf32>
    %8 = tpu.matmul %0, %7, %cst_10 {dimension_numbers = #tpu.dot_dimension_numbers<[2], [1], [0, 1], [0], [0, 0, 0, 1, 1, 0], [], []>} : vector<8x2x32xf32>, vector<32x32xf32>, vector<8x2x32xf32> -> vector<8x2x32xf32>
    %9 = vector.shape_cast %6 : vector<2x32xf32> to vector<1x2x32xf32>
    %10 = vector.broadcast %9 : vector<1x2x32xf32> to vector<8x2x32xf32>
    %11 = arith.addf %8, %10 : vector<8x2x32xf32>
    %cst_11 = arith.constant 0.000000e+00 : f32
    %12 = vector.broadcast %cst_11 : f32 to vector<8x2x32xf32>
    %13 = arith.maximumf %11, %12 : vector<8x2x32xf32>
    %c0_12 = arith.constant 0 : index
    %c0_13 = arith.constant 0 : index
    %14 = vector.load %arg6[%c0_12, %c0_13] : memref<1x32xf32, #tpu.memory_space<vmem>>, vector<1x32xf32>
    %15 = vector.shape_cast %14 : vector<1x32xf32> to vector<1x1x32xf32>
    %16 = vector.broadcast %15 : vector<1x1x32xf32> to vector<8x2x32xf32>
    %17 = arith.mulf %13, %16 : vector<8x2x32xf32>
    %cst_14 = arith.constant dense<0.000000e+00> : vector<8x2xf32>
    %18 = vector.multi_reduction <add>, %17, %cst_14 [2] : vector<8x2x32xf32> to vector<8x2xf32>
    %19 = tpu.transpose %18, [1, 0] : vector<8x2xf32> -> vector<2x8xf32>
    %cst_15 = arith.constant dense<0xFF800000> : vector<2xf32>
    %20 = vector.multi_reduction <maximumf>, %19, %cst_15 [1] : vector<2x8xf32> to vector<2xf32>
    %21 = vector.shape_cast %20 : vector<2xf32> to vector<2x1xf32>
    %22 = vector.broadcast %21 : vector<2x1xf32> to vector<2x8xf32>
    %23 = arith.subf %19, %22 : vector<2x8xf32>
    %24 = math.exp %23 : vector<2x8xf32>
    %cst_16 = arith.constant dense<0.000000e+00> : vector<2xf32>
    %25 = vector.multi_reduction <add>, %24, %cst_16 [1] : vector<2x8xf32> to vector<2xf32>
    %26 = vector.shape_cast %25 : vector<2xf32> to vector<2x1xf32>
    %27 = vector.broadcast %26 : vector<2x1xf32> to vector<2x8xf32>
    %28 = arith.divf %24, %27 : vector<2x8xf32>
    %c0_17 = arith.constant 0 : index
    %c0_18 = arith.constant 0 : index
    %29 = vector.load %arg7[%c0_17, %c0_18] : memref<2x8xf32, #tpu.memory_space<vmem>>, vector<2x8xf32>
    tpu.vector_store %arg7[%c0_17, %c0_18], %28 {strides = array<i32>} : memref<2x8xf32, #tpu.memory_space<vmem>>, vector<2x8xf32>,
    return
  }
  func.func @transform_0(%arg0: i32) -> (i32, i32) {
    %c0_i32 = arith.constant 0 : i32
    %c0_i32_0 = arith.constant 0 : i32
    return %arg0, %c0_i32 : i32, i32
  }
  func.func @transform_1(%arg0: i32) -> (i32, i32, i32) {
    %c0_i32 = arith.constant 0 : i32
    %c0_i32_0 = arith.constant 0 : i32
    %c0_i32_1 = arith.constant 0 : i32
    return %c0_i32, %arg0, %c0_i32_0 : i32, i32, i32
  }
  func.func @transform_2(%arg0: i32) -> (i32, i32) {
    %c0_i32 = arith.constant 0 : i32
    %c0_i32_0 = arith.constant 0 : i32
    %c0_i32_1 = arith.constant 0 : i32
    return %c0_i32, %c0_i32_0 : i32, i32
  }
  func.func @transform_3(%arg0: i32) -> (i32, i32) {
    %c0_i32 = arith.constant 0 : i32
    %c0_i32_0 = arith.constant 0 : i32
    %c0_i32_1 = arith.constant 0 : i32
    return %c0_i32, %c0_i32_0 : i32, i32
  }
  func.func @transform_4(%arg0: i32) -> (i32, i32) {
    %c0_i32 = arith.constant 0 : i32
    %c0_i32_0 = arith.constant 0 : i32
    %c0_i32_1 = arith.constant 0 : i32
    return %c0_i32, %c0_i32_0 : i32, i32
  }
  func.func @transform_5(%arg0: i32) -> (i32, i32) {
    %c0_i32 = arith.constant 0 : i32
    %c0_i32_0 = arith.constant 0 : i32
    %c0_i32_1 = arith.constant 0 : i32
    return %c0_i32, %c0_i32_0 : i32, i32
  }
  func.func @transform_6(%arg0: i32) -> (i32, i32) {
    %c0_i32 = arith.constant 0 : i32
    %c0_i32_0 = arith.constant 0 : i32
    return %arg0, %c0_i32 : i32, i32
  }
}

</mosaic_0001>

<bundles_post_ra>
// kernel: tpu_custom_call.1
= control target key start
LH: loop header
LB: loop body
LE: loop exit
PB: predicated region body
PF: predicated region fallthrough
CT: control target
= control target key end

     0   :  { %11 = vsyncpa [#allocation3], 0  ;;  %s895_s0 = inlined_call_operand.hbm [shape: f32[2,32], index: 0, kind: input, shape index: {}]   ;;  %s896_s1 = inlined_call_operand.hbm [shape: f32[8,2,32], index: 1, kind: input, shape index: {}]   ;;  %s897_s2 = inlined_call_operand.hbm [shape: f32[32,32], index: 2, kind: input, shape index: {}]   ;;  %s898_s3 = inlined_call_operand.hbm [shape: f32[32,32], index: 3, kind: input, shape index: {}]   ;;  %s899_s4 = inlined_call_operand.vmem [shape: f32[1,32], index: 4, kind: input, shape index: {}]   ;;  %s900_s5 = inlined_call_operand.vmem [shape: f32[1,32], index: 5, kind: input, shape index: {}]   ;;  %s901_s6 = inlined_call_operand.hbm [shape: f32[2,8], index: 6, kind: output, shape index: {}]  }
   0x1   :  { %12 = vsyncpa [#allocation6], 0 }
   0x2   :  { %13 = vsyncpa [#allocation9], 0 }
   0x3   :  { %14 = vsyncpa [#allocation4], 0  ;;  %s743_s21 = smov [#allocation5]   ;;  %s625_s25 = scalar_lea.hbm %s896_s1, 256 }
   0x4   :  { %s30_s22 = sshll.u32 %s743_s21, 4  ;;  %p626_p0 = scmp.ne.s32.totalorder %s896_s1, %s625_s25  ;;  %s31_s22 = int_to_ptr.vmem [resolvable:$true] %s30_s22 }
   0x5   :  { %p629_p1 = scmp.lt.u32.totalorder %s625_s25, %s896_s1 }
   0x7   :  { %p631_p2 = pnand %p629_p1, %p626_p0 }
   0x9   :  { %634 = shalt.err (!%p631_p2)
}
   0xa   :  { %s635_s30 = scalar_lea.vmem %s31_s22, 256  ;;  %p640_p4 = scmp.lt.s32.totalorder %s31_s22, %s31_s22 }
   0xb   :  { %p636_p3 = scmp.ne.s32.totalorder %s31_s22, %s635_s30  ;;  %p641_p5 = scmp.lt.s32.totalorder %s635_s30, %s635_s30 }
   0xd   :  { %p642_p6 = por %p641_p5, %p640_p4 }
   0xf   :  { %p643_p7 = pnand %p642_p6, %p636_p3 }
  0x11   :  { %646 = shalt.err (!%p643_p7)
}
  0x12   :  { %s744_s7 = smov 32   ;;  %s745_s8 = smov 2  }
  0x13   :  { %36 = dma.hbm_to_vmem [thread:$0]  %s896_s1, 256, %s31_s22, [#allocation6], %s744_s7, %s744_s7, %s745_s8  }
  0x14   :  { %s746_s11 = smov [#allocation2]   ;;  %s747_s13 = smov [#allocation7]  }
  0x15   :  { %s21_s12 = sshll.u32 %s746_s11, 4  ;;  %s42_s14 = sshll.u32 %s747_s13, 4  ;;  %s22_s12 = int_to_ptr.vmem [resolvable:$true] %s21_s12  ;;  %s43_s14 = int_to_ptr.vmem [resolvable:$true] %s42_s14 }
  0x16   :  { %s647_s17 = scalar_lea.hbm %s895_s0, 32 }
  0x17   :  { %p648_p8 = scmp.ne.s32.totalorder %s895_s0, %s647_s17  ;;  %p651_p9 = scmp.lt.u32.totalorder %s647_s17, %s895_s0 }
  0x19   :  { %p653_p10 = pnand %p651_p9, %p648_p8 }
  0x1b   :  { %656 = shalt.err (!%p653_p10)
}
  0x1c   :  { %s657_s1 = scalar_lea.vmem %s22_s12, 32  ;;  %p662_p12 = scmp.lt.s32.totalorder %s22_s12, %s22_s12 }
  0x1d   :  { %p658_p11 = scmp.ne.s32.totalorder %s22_s12, %s657_s1  ;;  %p663_p13 = scmp.lt.s32.totalorder %s657_s1, %s657_s1 }
  0x1f   :  { %p664_p0 = por %p663_p13, %p662_p12 }
  0x21   :  { %p665_p1 = pnand %p664_p0, %p658_p11 }
  0x23   :  { %668 = shalt.err (!%p665_p1)
}
  0x24   :  { %24 = dma.hbm_to_vmem [thread:$0]  %s895_s0, 32, %s22_s12, [#allocation3]  }
  0x25   :  { %s669_s26 = scalar_lea.hbm %s897_s2, 512 }
  0x26   :  { %p670_p2 = scmp.ne.s32.totalorder %s897_s2, %s669_s26  ;;  %p673_p3 = scmp.lt.u32.totalorder %s669_s26, %s897_s2 }
  0x28   :  { %p675_p4 = pnand %p673_p3, %p670_p2 }
  0x2a   :  { %678 = shalt.err (!%p675_p4)
}
  0x2b   :  { %s679_s7 = scalar_lea.vmem %s43_s14, 512  ;;  %p684_p6 = scmp.lt.s32.totalorder %s43_s14, %s43_s14 }
  0x2c   :  { %p680_p5 = scmp.ne.s32.totalorder %s43_s14, %s679_s7  ;;  %p685_p7 = scmp.lt.s32.totalorder %s679_s7, %s679_s7 }
  0x2e   :  { %p686_p8 = por %p685_p7, %p684_p6 }
  0x30   :  { %p687_p9 = pnand %p686_p8, %p680_p5 }
  0x32   :  { %690 = shalt.err (!%p687_p9)
}
  0x33   :  { %s748_s0 = smov 128   ;;  %s749_s8 = smov 8  }
  0x34   :  { %48 = dma.hbm_to_vmem [thread:$0]  %s897_s2, 512, %s43_s14, [#allocation6], %s748_s0, %s748_s0, %s749_s8  }
  0x35   :  { %s750_s11 = smov [#allocation8]   ;;  %s691_s16 = scalar_lea.hbm %s898_s3, 512 }
  0x36   :  { %s54_s12 = sshll.u32 %s750_s11, 4  ;;  %p692_p10 = scmp.ne.s32.totalorder %s898_s3, %s691_s16  ;;  %s55_s12 = int_to_ptr.vmem [resolvable:$true] %s54_s12 }
  0x37   :  { %p695_p11 = scmp.lt.u32.totalorder %s691_s16, %s898_s3 }
  0x39   :  { %p697_p12 = pnand %p695_p11, %p692_p10 }
  0x3b   :  { %700 = shalt.err (!%p697_p12)
}
  0x3c   :  { %s701_s21 = scalar_lea.vmem %s55_s12, 512  ;;  %p706_p0 = scmp.lt.s32.totalorder %s55_s12, %s55_s12 }
  0x3d   :  { %p702_p13 = scmp.ne.s32.totalorder %s55_s12, %s701_s21  ;;  %p707_p1 = scmp.lt.s32.totalorder %s701_s21, %s701_s21 }
  0x3f   :  { %p708_p2 = por %p707_p1, %p706_p0 }
  0x41   :  { %p709_p3 = pnand %p708_p2, %p702_p13 }
  0x43   :  { %712 = shalt.err (!%p709_p3)
}
  0x44   :  { %60 = dma.hbm_to_vmem [thread:$0]  %s898_s3, 512, %s55_s12, [#allocation9], %s748_s0, %s748_s0, %s749_s8  }
  0x45   :  { %735 = dma.done.wait [#allocation3], 32  }
  0x46   :  { %736 = vsyncadd [#allocation3], 4294967264 }
  0x47   :  { %737 = dma.done.wait [#allocation6], 768  }
  0x48   :  { %738 = vsyncadd [#allocation6], 4294966528 }
  0x49   :  { %739 = dma.done.wait [#allocation9], 512  }
  0x4a   :  { %740 = vsyncadd [#allocation9], 4294966784  ;;  %v751_v0 = vmov 0.0|0.0   ;;  %vm752_vm0 = vmmov 0   ;;  %v753_v1 = vmov 0.0   ;;  %v200_v2 = vlaneseq  ;;  %v86_v8 = vld [vmem:[#allocation7] sm:$0xff] }
  0x4b   :  { %588 = vmatprep.subr.bf16.mxu0 %v751_v0  ;;  %574 = vmatprep.mubr.msk.f32.mxu0 %vm752_vm0, %v753_v1  ;;  %v754_v3 = vmov 1983009808   ;;  %vm97_vm1 = vcmask 261120   ;;  %v87_v9 = vld [vmem:[#allocation7 + $0x8] sm:$0xff]  ;;  %v183_v10 = vld [vmem:[#allocation8] sm:$0xff]  ;;  %v88_v14 = vld [vmem:[#allocation7 + $0x10] sm:$0xff] }
  0x4c   :  { %v198_v4 = vunpack.c.l.s4 %v754_v3  ;;  %v840_v6 = vshrl.u32 %v200_v2, 7  ;;  %vm844_vm2 = vmpackc.low %vm97_vm1, %vm97_vm1  ;;  %v589_v11 = vpack.c.bf16 %v87_v9, %v86_v8  ;;  %v184_v12 = vld [vmem:[#allocation8 + $0x8] sm:$0xff]  ;;  %v185_v15 = vld [vmem:[#allocation8 + $0x10] sm:$0xff]  ;;  %vm398_vm3 = vcmask 254976  }
  0x4d   :  { %v596_v13 = vpack.c.bf16 %v184_v12, %v183_v10  ;;  %v186_v16 = vld [vmem:[#allocation8 + $0x18] sm:$0xff]  ;;  %v77_v19 = vld [vmem:[#allocation5] sm:$0x3]  ;;  %v78_v20 = vld [vmem:[#allocation5 + $0x2] sm:$0x3]  ;;  %vm465_vm4 = vcmask 1041409  }
  0x4e   :  { %v199_v5 = vunpack.c.0.s8 %v198_v4  ;;  %591 = vmatpush3.bf16.xpose.msk.msra.mxu0 %vm844_vm2, %v589_v11  ;;  %v602_v18 = vpack.c.bf16 %v186_v16, %v185_v15  ;;  %v79_v21 = vld [vmem:[#allocation5 + $0x4] sm:$0x3]  ;;  %v89_v22 = vld [vmem:[#allocation7 + $0x18] sm:$0xff]  ;;  %v80_v23 = vld [vmem:[#allocation5 + $0x6] sm:$0x3]  ;;  %v195_v24 = vcombine.low %v77_v19, %v78_v20  ;;  %vm467_vm5 = vcmask 1042434  }
  0x4f   :  { %598 = vmatprep.subr.msk.bf16.mxu1 %vm844_vm2, %v596_v13  ;;  %592 = vmatprep.subr.bf16.mxu0 %v751_v0  ;;  %v81_v25 = vld [vmem:[#allocation5 + $0x8] sm:$0x3]  ;;  %v196_v26 = vcombine.low %v79_v21, %v80_v23  ;;  %v82_v27 = vld [vmem:[#allocation5 + $0xa] sm:$0x3]  ;;  %v83_v28 = vld [vmem:[#allocation5 + $0xc] sm:$0x3]  ;;  %v593_v31 = vpack.c.bf16 %v89_v22, %v88_v14 }
  0x50   :  { %v202_v17 = vsub.s32 %v199_v5, %v840_v6  ;;  %601 = vmatpush3.bf16.xpose.msk.msra.mxu1 %vm844_vm2, %v596_v13  ;;  %v84_v29 = vld [vmem:[#allocation5 + $0xe] sm:$0x3]  ;;  %v212_v33 = vcombine.low %v81_v25, %v82_v27  ;;  %v85_v38 = vld [vmem:[#allocation2] sm:$0x3]  ;;  %vm469_vm6 = vcmask 1043459   ;;  %vm471_vm7 = vcmask 1044484  }
  0x51   :  { %604 = vmatprep.subr.msk.bf16.mxu1 %vm844_vm2, %v602_v18  ;;  %v213_v34 = vcombine.low %v83_v28, %v84_v29  ;;  %v542_v40 = vld [vmem:[%s899_s4] ss:$0 sm:$0xff]  ;;  %vm473_vm8 = vcmask 1045509   ;;  %vm475_vm9 = vcmask 1046534   ;;  %vm477_vm10 = vcmask 1047559   ;;  %s755_s4 = smov [#allocation10]  }
  0x52   :  { %v203_v30 = vrot.slane %v195_v24, %v202_v17  ;;  %v210_v32 = vrot.slane %v196_v26, %v202_v17  ;;  %v220_v36 = vrot.slane %v212_v33, %v202_v17  ;;  %v554_v58 = vld [vmem:[%s900_s5] ss:$0 sm:$0xff]  ;;  %v432_v24 = vand.u32 127, %v200_v2  ;;  %s531_s5 = sshll.u32 %s755_s4, 4  ;;  %s532_s5 = int_to_ptr.vmem [resolvable:$true] %s531_s5 }
  0x53   :  { %v227_v37 = vrot.slane %v213_v34, %v202_v17  ;;  %vm512_vm11 = vcmask 58368   ;;  %s713_s24 = scalar_lea.vmem %s532_s5, 32  ;;  %p718_p5 = scmp.lt.s32.totalorder %s532_s5, %s532_s5 }
  0x54   :  { %v211_v35 = vcombine.low %v203_v30, %v210_v32  ;;  %v435_v27 = vsub.s32 %v432_v24, %v840_v6  ;;  %p714_p4 = scmp.ne.s32.totalorder %s532_s5, %s713_s24  ;;  %p719_p6 = scmp.lt.s32.totalorder %s713_s24, %s713_s24 }
  0x55   :  { %v228_v39 = vcombine.low %v220_v36, %v227_v37 }
  0x56   :  { %595 = vmatpush3.bf16.xpose.msk.msra.mxu0 %vm844_vm2, %v593_v31  ;;  %585 = vmatprep.mubr.msk.f32.mxu1 %vm97_vm1, %v211_v35  ;;  %p720_p7 = por %p719_p6, %p718_p5 }
  0x58   :  { %607 = vmatpush3.bf16.xpose.msk.msra.mxu1 %vm844_vm2, %v602_v18  ;;  %p721_p8 = pnand %p720_p7, %p714_p4 }
  0x5d   :  { %575 = vmatmul.mubr.msk.f32.vlgmr.msra.gmra.mrb[0].mxu0 %vm97_vm1, %v85_v38 }
  0x5f   :  { %586 = vmatmul.mubr.msk.f32.vlgmr.msra.gmra.mrb[0].mxu1 %vm97_vm1, %v228_v39 }
 0x130   :  { %v179_v41 = vpop.f32.mrb[0].mxu0 }
 0x131   :  { %v180_v42 = vadd.f32 %v542_v40, %v179_v41  ;;  %v576_v43 = vpop.f32.mrb[1].mxu0 }
 0x132   :  { %v587_v44 = vpop.f32.mrb[0].mxu1 }
 0x133   :  { %v230_v45 = vcombine.low %v180_v42, %v180_v42  ;;  %v322_v46 = vpop.f32.mrb[1].mxu1 }
 0x135   :  { %v237_v47 = vrot.slane %v230_v45, %v202_v17 }
 0x137   :  { %v238_v48 = vcombine.low %v237_v47, %v237_v47 }
 0x139   :  { %v328_v49 = vadd.f32 %v587_v44, %v238_v48  ;;  %v323_v50 = vadd.f32 %v322_v46, %v238_v48 }
 0x13b   :  { %v350_v51 = vcombine.high %v328_v49, %v328_v49  ;;  %v357_v52 = vrot.slane %v328_v49, %v202_v17  ;;  %v333_v53 = vcombine.high %v323_v50, %v323_v50  ;;  %v340_v54 = vrot.slane %v323_v50, %v202_v17 }
 0x13d   :  { %v365_v55 = vcombine.high %v357_v52, %v357_v52  ;;  %v347_v56 = vrot.slane %v333_v53, %v202_v17  ;;  %v348_v57 = vcombine.high %v340_v54, %v340_v54  ;;  %v364_v59 = vrot.slane %v350_v51, %v202_v17 }
 0x13e   :  { %v375_v60 = vmax.f32 %v340_v54, 0.0  ;;  %v379_v7 = vmax.f32 %v357_v52, 0.0 }
 0x13f   :  { %v377_v61 = vmax.f32 %v347_v56, 0.0  ;;  %v376_v62 = vmax.f32 %v348_v57, 0.0  ;;  %v380_v63 = vmax.f32 %v365_v55, 0.0  ;;  %v349_v0 = vcombine.high %v347_v56, %v347_v56 }
 0x140   :  { %v390_v1 = vmul.f32 %v554_v58, %v375_v60  ;;  %v366_v11 = vcombine.high %v364_v59, %v364_v59  ;;  %v394_v13 = vmul.f32 %v554_v58, %v379_v7  ;;  %v381_v14 = vmax.f32 %v364_v59, 0.0 }
 0x141   :  { %v392_v3 = vmul.f32 %v554_v58, %v377_v61  ;;  %v391_v5 = vmul.f32 %v554_v58, %v376_v62  ;;  %v395_v9 = vmul.f32 %v554_v58, %v380_v63  ;;  %v378_v10 = vmax.f32 %v349_v0, 0.0 }
 0x142   :  { %v399_v4 = vsel %vm398_vm3, %v390_v1, 0.0  ;;  %v382_v17 = vmax.f32 %v366_v11, 0.0  ;;  %v411_v18 = vsel %vm398_vm3, %v394_v13, 0.0  ;;  %v396_v19 = vmul.f32 %v554_v58, %v381_v14 }
 0x143   :  { %400 = vadd.xlane.f32.xlu0 %v399_v4  ;;  %v405_v8 = vsel %vm398_vm3, %v392_v3, 0.0  ;;  %v402_v12 = vsel %vm398_vm3, %v391_v5, 0.0  ;;  %v414_v15 = vsel %vm398_vm3, %v395_v9, 0.0  ;;  %v393_v16 = vmul.f32 %v554_v58, %v378_v10 }
 0x144   :  { %406 = vadd.xlane.f32.xlu1 %v405_v8  ;;  %v397_v21 = vmul.f32 %v554_v58, %v382_v17  ;;  %v417_v22 = vsel %vm398_vm3, %v396_v19, 0.0 }
 0x145   :  { %v408_v20 = vsel %vm398_vm3, %v393_v16, 0.0 }
 0x146   :  { %v420_v23 = vsel %vm398_vm3, %v397_v21, 0.0 }
 0x147   :  { %403 = vadd.xlane.f32.xlu0 %v402_v12 }
 0x148   :  { %415 = vadd.xlane.f32.xlu1 %v414_v15 }
 0x14b   :  { %412 = vadd.xlane.f32.xlu0 %v411_v18 }
 0x14c   :  { %409 = vadd.xlane.f32.xlu1 %v408_v20 }
 0x14f   :  { %418 = vadd.xlane.f32.xlu0 %v417_v22 }
 0x150   :  { %421 = vadd.xlane.f32.xlu1 %v420_v23 }
 0x1d0   :  { %v401_v25 = vpop.xlane.xlu0 %400 }
 0x1d1   :  { %v407_v26 = vpop.xlane.xlu1 %406  ;;  %v436_v31 = vrot.slane %v401_v25, %v435_v27 }
 0x1d2   :  { %v444_v34 = vrot.slane %v407_v26, %v435_v27 }
 0x1d4   :  { %v404_v28 = vpop.xlane.xlu0 %403 }
 0x1d5   :  { %v440_v29 = vrot.slane %v404_v28, %v435_v27  ;;  %v416_v30 = vpop.xlane.xlu1 %415 }
 0x1d6   :  { %v456_v2 = vrot.slane %v416_v30, %v435_v27 }
 0x1d7   :  { %v466_v32 = vsel %vm465_vm4, %v440_v29, %v436_v31 }
 0x1d8   :  { %v413_v33 = vpop.xlane.xlu0 %412  ;;  %v468_v38 = vsel %vm467_vm5, %v444_v34, %v466_v32 }
 0x1d9   :  { %v410_v35 = vpop.xlane.xlu1 %409  ;;  %v452_v37 = vrot.slane %v413_v33, %v435_v27 }
 0x1da   :  { %v448_v36 = vrot.slane %v410_v35, %v435_v27 }
 0x1dc   :  { %v470_v39 = vsel %vm469_vm6, %v448_v36, %v468_v38  ;;  %v419_v40 = vpop.xlane.xlu0 %418 }
 0x1dd   :  { %v460_v6 = vrot.slane %v419_v40, %v435_v27  ;;  %v422_v41 = vpop.xlane.xlu1 %421  ;;  %v472_v42 = vsel %vm471_vm7, %v452_v37, %v470_v39 }
 0x1de   :  { %v464_v43 = vrot.slane %v422_v41, %v435_v27  ;;  %v474_v44 = vsel %vm473_vm8, %v456_v2, %v472_v42 }
 0x1df   :  { %v476_v45 = vsel %vm475_vm9, %v460_v6, %v474_v44 }
 0x1e0   :  { %v478_v46 = vsel %vm477_vm10, %v464_v43, %v476_v45 }
 0x1e1   :  { %480 = vxpose.xlu0.b32.start.end [1/1] (short) (narrow) %v478_v46, 8 }
 0x261   :  { %v496_v47 = vpop.trf.xlu0 }
 0x262   :  { %v513_v48 = vsel %vm512_vm11, %v496_v47, -inf }
 0x263   :  { %514 = vmax.xlane.f32.xlu1 %v513_v48 }
 0x2f0   :  { %v515_v49 = vpop.xlane.xlu1 %514 }
 0x2f1   :  { %v516_v50 = vsub.f32 %v496_v47, %v515_v49 }
 0x2f3   :  { %v517_v51 = vmul.f32 1.442695, %v516_v50 }
 0x2f5   :  { %621 = vpow2.f32 %v517_v51 }
 0x2ff   :  { %v622_v52 = vpop.eup %621 }
 0x300   :  { %v519_v53 = vsel %vm512_vm11, %v622_v52, 0.0 }
 0x301   :  { %520 = vadd.xlane.f32.xlu1 %v519_v53 }
 0x38e   :  { %v521_v54 = vpop.xlane.xlu1 %520 }
 0x38f   :  { %623 = vrcp.f32 %v521_v54 }
 0x399   :  { %v624_v55 = vpop.eup %623 }
 0x39a   :  { %v523_v56 = vmul.f32 %v624_v55, %v622_v52 }
 0x39c   :  { %524 = vst.msk [vmem:[#allocation10] sm:$0x3] %vm512_vm11, %v523_v56 }
 0x39d   :  { %724 = shalt.err (!%p721_p8)
}
 0x39e   :  { %s725_s27 = scalar_lea.hbm %s901_s6, 32 }
 0x39f   :  { %p726_p9 = scmp.ne.s32.totalorder %s901_s6, %s725_s27  ;;  %p729_p10 = scmp.lt.u32.totalorder %s725_s27, %s901_s6 }
 0x3a1   :  { %p731_p11 = pnand %p729_p10, %p726_p9 }
 0x3a3   :  { %734 = shalt.err (!%p731_p11)
}
 0x3a4   :  { %534 = dma.vmem_to_hbm [thread:$0]  %s532_s5, 32, %s901_s6, [#allocation4]  }
 0x3a5   :  { %741 = dma.done.wait [#allocation4], 32  }
 0x3a6   :  { %742 = vsyncadd [#allocation4], 4294967264 }
 0x3a7   :  { %538 = vsyncpa [#allocation3], 1 }
 0x3a8   :  { %539 = vsyncpa [#allocation6], 1 }
 0x3a9   :  { %540 = vsyncpa [#allocation9], 1 }
 0x3aa   :  { %541 = vsyncpa [#allocation4], 1 }

</bundles_post_ra>
